<compile_context>
chip_gen: v7x
topology: tpu7x:2x2x1
jax: 0.10.0
libtpu: 0.0.40
codegen_flags: <defaults>
</compile_context>

<pallas_src>
import jax
import jax.numpy as jnp
from jax.experimental import pallas as pl
from jax.experimental.pallas import tpu as pltpu


# ----------------------------- Pallas kernel --------------------------------

def xpos_kernel(x_ref, cs_ref, sse_ref, sso_ref, o_ref):
    cdt = cs_ref.dtype                      # bf16 for bf16 inputs, f32 otherwise
    x = x_ref[...].astype(cdt)              # (bh_tile, sd_tile)
    cs = cs_ref[...]                        # (1, sd_tile)  duplicate_interleave(cos*scale)
    sse = sse_ref[...]                      # (1, sd_tile)  -sin*scale on even lanes, 0 on odd
    sso = sso_ref[...]                      # (1, sd_tile)   sin*scale on odd lanes, 0 on even

    # Within-pair swap via two lane shifts; wrap-around lanes always multiply a
    # zeroed table entry (tile boundaries are even), so they never leak.
    fwd = jnp.roll(x, 1, axis=-1)           # fwd[j] = x[j-1]  (used at odd j)
    bwd = jnp.roll(x, -1, axis=-1)          # bwd[j] = x[j+1]  (used at even j)
    # TODO(synk): on v7x a bf16 bitcast-to-u32 16-bit rotate (pure VALU pair swap, one
    # merged signed table) would cut the op count further; kept the portable form here.
    o_ref[...] = (x * cs + bwd * sse + fwd * sso).astype(o_ref.dtype)


# ----------------------------- tiling helpers --------------------------------

def _vmem_capacity_bytes():
    try:
        return int(pltpu.get_tpu_info().vmem_capacity_bytes)
    except Exception:
        return 64 << 20        # assume the smallest (v7x-class) when query unavailable


def _choose_tiles(BH, SD, itemsize, target_block_bytes, max_block_bytes):
    """Pick (bh_tile, sd_tile) for the (BH, SD) view.

    sd_tile is SD itself (full dim) or a multiple-of-128 divisor of SD so that an
    8-row block stays under max_block_bytes; bh_tile targets ~target_block_bytes.
    """
    if 8 * SD * itemsize <= max_block_bytes:
        sd_tile = SD
    else:
        sd_tile = None
        cap_lanes = max(128, (max_block_bytes // (8 * itemsize)) // 128 * 128)
        c = min((SD // 128) * 128, cap_lanes)
        while c >= 128:
            if SD % c == 0:
                sd_tile = c
                break
            c -= 128
        if sd_tile is None:
            sd_tile = SD        # rare fallback (SD has no 128-multiple divisor)

    t = max(1, target_block_bytes // max(1, sd_tile * itemsize))
    if t >= BH:
        bh_tile = BH
    else:
        bh_tile = min(BH, max(8, (t // 8) * 8))

    # Guarantee a few grid steps (megacore sharding + pipelining) when possible.
    def n_steps(bt):
        return pl.cdiv(BH, bt) * pl.cdiv(SD, sd_tile)

    while n_steps(bh_tile) < 4 and bh_tile > 8:
        nt = max(8, ((bh_tile // 2) // 8) * 8)
        if nt == bh_tile:
            break
        bh_tile = nt
    return bh_tile, sd_tile


def xpos_apply_pallas(x, cs, sse, sso):
    """x: (B, H, S, D);  cs/sse/sso: (S, D) tables in the compute dtype."""
    B, H, S, D = x.shape
    assert D % 2 == 0, "XPOS pair-swap requires an even head_dim"
    BH, SD = B * H, S * D
    xf = x.reshape(BH, SD)
    cs_f = cs.reshape(1, SD)
    sse_f = sse.reshape(1, SD)
    sso_f = sso.reshape(1, SD)

    itemsize = x.dtype.itemsize
    tbl_itemsize = cs_f.dtype.itemsize

    vmem_cap = _vmem_capacity_bytes()
    small_vmem = vmem_cap <= (64 << 20)                 # v7x-class TensorCore
    target_block_bytes = (3 << 20) if small_vmem else (8 << 20)
    max_block_bytes = (6 << 20) if small_vmem else (12 << 20)

    bh_tile, sd_tile = _choose_tiles(BH, SD, itemsize, target_block_bytes, max_block_bytes)
    assert sd_tile % 2 == 0, "S*D tile must be even to keep rotate pairs intact"

    grid = (pl.cdiv(BH, bh_tile), pl.cdiv(SD, sd_tile))

    block_bytes = bh_tile * sd_tile * itemsize
    table_block_bytes = 8 * sd_tile * tbl_itemsize      # (1, sd_tile) pads to 8 sublanes
    # 2x double-buffered x block + 2x output block + 3 tables (2 buffers each) + slack
    vmem_needed = 4 * block_bytes + 6 * table_block_bytes + (2 << 20)
    soft_cap = (40 << 20) if small_vmem else (100 << 20)
    vmem_limit = int(min(max(24 << 20, vmem_needed), soft_cap))

    # TODO(synk): tables could use pipeline_mode=pl.Buffered(1) (constant over the BH
    # axis) and the call could take input_output_aliases={0: 0} when applied in-place
    # inside an attention stack; both omitted here for portability / because the test
    # re-reads x after the call.
    out = pl.pallas_call(
        xpos_kernel,
        out_shape=jax.ShapeDtypeStruct((BH, SD), x.dtype),
        grid=grid,
        in_specs=[
            pl.BlockSpec((bh_tile, sd_tile), lambda i, j: (i, j)),
            pl.BlockSpec((1, sd_tile), lambda i, j: (0, j)),
            pl.BlockSpec((1, sd_tile), lambda i, j: (0, j)),
            pl.BlockSpec((1, sd_tile), lambda i, j: (0, j)),
        ],
        out_specs=pl.BlockSpec((bh_tile, sd_tile), lambda i, j: (i, j)),
        compiler_params=pltpu.CompilerParams(
            dimension_semantics=("parallel", "parallel"),
            vmem_limit_bytes=vmem_limit,
        ),
    )(xf, cs_f, sse_f, sso_f)
    return out.reshape(B, H, S, D)


# --------------------------- XPOS module (glue) ------------------------------

def duplicate_interleave(m):
    # (N, K) -> (N, 2K) with each column repeated twice, interleaved.
    return jnp.repeat(m, 2, axis=-1)


def fixed_pos_embedding(seq_len, dim):
    inv_freq = 1.0 / 10000.0 ** (jnp.arange(0, dim, dtype=jnp.float32) / dim)
    sinusoid_inp = jnp.arange(0, seq_len, dtype=jnp.float32)[:, None] * inv_freq[None, :]
    return jnp.sin(sinusoid_inp), jnp.cos(sinusoid_inp)


class XPOS:
    def __init__(self, head_dim, max_position_embeddings, scale_base=512):
        self.head_dim = head_dim
        self.scale_base = scale_base
        self.max_seq_len_cached = max_position_embeddings
        self.cached = False
        self._table_cache = {}

    def set_scale_base(self, new_base):
        self.scale_base = new_base
        self.cached = False
        self._table_cache = {}

    def cache_buffers(self, length):
        hd = self.head_dim
        self.scale = (jnp.arange(0, hd, 2, dtype=jnp.float32) + 0.4 * hd) / (1.4 * hd)
        min_pos = -length // 2
        max_pos = length + min_pos
        exponents = jnp.arange(min_pos, max_pos, 1, dtype=jnp.float32) / self.scale_base
        scale = self.scale[None, :] ** exponents[:, None]            # (length, hd//2)
        sin, cos = fixed_pos_embedding(length, hd // 2)              # (length, hd//2)
        self.scale_cached = scale
        self.inv_scale_cached = 1.0 / scale
        self.cos_cached = cos
        self.sin_cached = sin
        self.cached = True
        self._table_cache = {}

    def _tables(self, offset, length, downscale, compute_dtype):
        key = (int(offset), int(length), bool(downscale), jnp.dtype(compute_dtype).name)
        hit = self._table_cache.get(key)
        if hit is not None:
            return hit
        scale = self.inv_scale_cached if downscale else self.scale_cached
        # Slice unconditionally (the original's `scale.shape[0] > length` guard is a
        # no-op for every non-erroring path of the reference implementation).
        scale = scale[offset:length]
        sin = self.sin_cached[offset:length]
        cos = self.cos_cached[offset:length]

        cs = duplicate_interleave(cos * scale)                       # (S, D)
        ss = duplicate_interleave(sin * scale)                       # (S, D)
        even = (jnp.arange(self.head_dim) % 2) == 0                  # (D,)
        sse = jnp.where(even[None, :], -ss, 0.0)                     # even lanes: -ss
        sso = jnp.where(even[None, :], 0.0, ss)                      # odd  lanes:  ss
        tables = tuple(t.astype(compute_dtype) for t in (cs, sse, sso))
        self._table_cache[key] = tables
        return tables

    def __call__(self, x, offset, downscale=False):
        length = offset + x.shape[2]
        if not self.cached:
            self.cache_buffers(self.max_seq_len_cached)
        if length > self.max_seq_len_cached:
            raise NotImplementedError("Cannot increase buffer after initialization.")
        # bf16 inputs compute natively in bf16 (v6e/v7x VPU); everything else in f32.
        compute_dtype = jnp.bfloat16 if x.dtype == jnp.bfloat16 else jnp.float32
        cs, sse, sso = self._tables(offset, length, downscale, compute_dtype)
        return xpos_apply_pallas(x, cs, sse, sso)


# ------------------------------ reference ------------------------------------

def rotate_every_two_ref(x):
    x1 = x[..., ::2]
    x2 = x[..., 1::2]
    return jnp.stack((-x2, x1), axis=-1).reshape(x.shape)


def xpos_ref(x, sin, cos, scale):
    cs = duplicate_interleave(cos * scale)
    ss = duplicate_interleave(sin * scale)
    return x * cs + rotate_every_two_ref(x) * ss


# --------------------------------- main ---------------------------------------

if __name__ == "__main__":
    B, H, S, D = 2, 4, 8, 32           # batch, heads, seq, head_dim
    max_pos = 16
    offset = 2
    key = jax.random.PRNGKey(0)
    x = jax.random.normal(key, (B, H, S, D), dtype=jnp.float32)

    mod = XPOS(head_dim=D, max_position_embeddings=max_pos, scale_base=512)
    out = jax.block_until_ready(mod(x, offset=offset, downscale=False))

    # pure-JAX reference check (f32)
    length = offset + S
    scale_r = mod.scale_cached[offset:length]
    sin_r = mod.sin_cached[offset:length]
    cos_r = mod.cos_cached[offset:length]
    ref = xpos_ref(x, sin_r, cos_r, scale_r)
    assert out.shape == (B, H, S, D)
    assert jnp.allclose(out, ref, atol=1e-5, rtol=1e-5), "mismatch vs reference"

    # downscale path
    out_d = jax.block_until_ready(mod(x, offset=offset, downscale=True))
    ref_d = xpos_ref(x, sin_r, cos_r, mod.inv_scale_cached[offset:length])
    assert jnp.allclose(out_d, ref_d, atol=1e-5, rtol=1e-5), "mismatch (downscale)"

    # bf16-native compute path (looser, bf16-appropriate tolerances vs f32 reference)
    x_bf = x.astype(jnp.bfloat16)
    out_bf = jax.block_until_ready(mod(x_bf, offset=offset, downscale=False))
    assert out_bf.dtype == jnp.bfloat16
    assert jnp.allclose(out_bf.astype(jnp.float32), ref, atol=6e-2, rtol=6e-2), \
        "mismatch vs reference (bf16 path)"

    print("KERNEL_OK")
</pallas_src>

<mosaic_0001>
module attributes {stable_mosaic.version = 11 : i64} {
  func.func @xpos_kernel(%arg0: i32, %arg1: i32, %arg2: memref<8x256xf32, #tpu.memory_space<vmem>>, %arg3: memref<1x256xf32, #tpu.memory_space<vmem>>, %arg4: memref<1x256xf32, #tpu.memory_space<vmem>>, %arg5: memref<1x256xf32, #tpu.memory_space<vmem>>, %arg6: memref<8x256xf32, #tpu.memory_space<vmem>>) attributes {dimension_semantics = [#tpu.dimension_semantics<parallel>, #tpu.dimension_semantics<parallel>], iteration_bounds = array<i64: 1, 1>, scalar_prefetch = 0 : i64, scratch_operands = 0 : i64, tpu.core_type = #tpu.core_type<tc>, window_params = [{transform_indices = @transform_0, window_bounds = array<i64: 8, 256>}, {transform_indices = @transform_1, window_bounds = array<i64: 1, 256>}, {transform_indices = @transform_2, window_bounds = array<i64: 1, 256>}, {transform_indices = @transform_3, window_bounds = array<i64: 1, 256>}, {transform_indices = @transform_4, window_bounds = array<i64: 8, 256>}]} {
    %c0 = arith.constant 0 : index
    %c0_0 = arith.constant 0 : index
    %0 = vector.load %arg2[%c0, %c0_0] : memref<8x256xf32, #tpu.memory_space<vmem>>, vector<8x256xf32>
    %c0_1 = arith.constant 0 : index
    %c0_2 = arith.constant 0 : index
    %1 = vector.load %arg3[%c0_1, %c0_2] : memref<1x256xf32, #tpu.memory_space<vmem>>, vector<1x256xf32>
    %c0_3 = arith.constant 0 : index
    %c0_4 = arith.constant 0 : index
    %2 = vector.load %arg4[%c0_3, %c0_4] : memref<1x256xf32, #tpu.memory_space<vmem>>, vector<1x256xf32>
    %c0_5 = arith.constant 0 : index
    %c0_6 = arith.constant 0 : index
    %3 = vector.load %arg5[%c0_5, %c0_6] : memref<1x256xf32, #tpu.memory_space<vmem>>, vector<1x256xf32>
    %4 = vector.extract_strided_slice %0 {offsets = [0, 255], sizes = [8, 1], strides = [1, 1]} : vector<8x256xf32> to vector<8x1xf32>
    %5 = vector.extract_strided_slice %0 {offsets = [0, 0], sizes = [8, 255], strides = [1, 1]} : vector<8x256xf32> to vector<8x255xf32>
    %6 = tpu.concatenate %4, %5 in 1 : vector<8x1xf32>, vector<8x255xf32> -> vector<8x256xf32>
    %7 = vector.extract_strided_slice %0 {offsets = [0, 1], sizes = [8, 255], strides = [1, 1]} : vector<8x256xf32> to vector<8x255xf32>
    %8 = vector.extract_strided_slice %0 {offsets = [0, 0], sizes = [8, 1], strides = [1, 1]} : vector<8x256xf32> to vector<8x1xf32>
    %9 = tpu.concatenate %7, %8 in 1 : vector<8x255xf32>, vector<8x1xf32> -> vector<8x256xf32>
    %10 = vector.broadcast %1 : vector<1x256xf32> to vector<8x256xf32>
    %11 = arith.mulf %0, %10 : vector<8x256xf32>
    %12 = vector.broadcast %2 : vector<1x256xf32> to vector<8x256xf32>
    %13 = arith.mulf %9, %12 : vector<8x256xf32>
    %14 = arith.addf %11, %13 : vector<8x256xf32>
    %15 = vector.broadcast %3 : vector<1x256xf32> to vector<8x256xf32>
    %16 = arith.mulf %6, %15 : vector<8x256xf32>
    %17 = arith.addf %14, %16 : vector<8x256xf32>
    %c0_7 = arith.constant 0 : index
    %c0_8 = arith.constant 0 : index
    %18 = vector.load %arg6[%c0_7, %c0_8] : memref<8x256xf32, #tpu.memory_space<vmem>>, vector<8x256xf32>
    tpu.vector_store %arg6[%c0_7, %c0_8], %17 {strides = array<i32>} : memref<8x256xf32, #tpu.memory_space<vmem>>, vector<8x256xf32>,
    return
  }
  func.func @transform_0(%arg0: i32, %arg1: i32) -> (i32, i32) {
    %c0_i32 = arith.constant 0 : i32
    return %arg0, %arg1 : i32, i32
  }
  func.func @transform_1(%arg0: i32, %arg1: i32) -> (i32, i32) {
    %c0_i32 = arith.constant 0 : i32
    %c0_i32_0 = arith.constant 0 : i32
    return %c0_i32, %arg1 : i32, i32
  }
  func.func @transform_2(%arg0: i32, %arg1: i32) -> (i32, i32) {
    %c0_i32 = arith.constant 0 : i32
    %c0_i32_0 = arith.constant 0 : i32
    return %c0_i32, %arg1 : i32, i32
  }
  func.func @transform_3(%arg0: i32, %arg1: i32) -> (i32, i32) {
    %c0_i32 = arith.constant 0 : i32
    %c0_i32_0 = arith.constant 0 : i32
    return %c0_i32, %arg1 : i32, i32
  }
  func.func @transform_4(%arg0: i32, %arg1: i32) -> (i32, i32) {
    %c0_i32 = arith.constant 0 : i32
    return %arg0, %arg1 : i32, i32
  }
}

</mosaic_0001>

<bundles_post_ra>
// kernel: tpu_custom_call.1
= control target key start
LH: loop header
LB: loop body
LE: loop exit
PB: predicated region body
PF: predicated region fallthrough
CT: control target
= control target key end

     0   :  { %9 = vsyncpa [#allocation3], 0  ;;  %s231_s0 = inlined_call_operand.hbm [shape: f32[8,256], index: 0, kind: input, shape index: {}]   ;;  %s232_s1 = inlined_call_operand.vmem [shape: f32[1,256], index: 1, kind: input, shape index: {}]   ;;  %s233_s2 = inlined_call_operand.vmem [shape: f32[1,256], index: 2, kind: input, shape index: {}]   ;;  %s234_s3 = inlined_call_operand.vmem [shape: f32[1,256], index: 3, kind: input, shape index: {}]   ;;  %s235_s4 = inlined_call_operand.hbm [shape: f32[8,256], index: 4, kind: output, shape index: {}]  }
   0x1   :  { %10 = vsyncpa [#allocation4], 0  ;;  %s169_s15 = smov [#allocation2]   ;;  %s121_s19 = scalar_lea.hbm %s231_s0, 256 }
   0x2   :  { %s17_s16 = sshll.u32 %s169_s15, 4  ;;  %p122_p0 = scmp.ne.s32.totalorder %s231_s0, %s121_s19  ;;  %s18_s16 = int_to_ptr.vmem [resolvable:$true] %s17_s16 }
   0x3   :  { %p125_p1 = scmp.lt.u32.totalorder %s121_s19, %s231_s0 }
   0x5   :  { %p127_p2 = pnand %p125_p1, %p122_p0 }
   0x7   :  { %130 = shalt.err (!%p127_p2)
}
   0x8   :  { %s131_s24 = scalar_lea.vmem %s18_s16, 256  ;;  %p136_p4 = scmp.lt.s32.totalorder %s18_s16, %s18_s16 }
   0x9   :  { %p132_p3 = scmp.ne.s32.totalorder %s18_s16, %s131_s24  ;;  %p137_p5 = scmp.lt.s32.totalorder %s131_s24, %s131_s24 }
   0xb   :  { %p138_p6 = por %p137_p5, %p136_p4 }
   0xd   :  { %p139_p7 = pnand %p138_p6, %p132_p3 }
   0xf   :  { %142 = shalt.err (!%p139_p7)
}
  0x10   :  { %20 = dma.hbm_to_vmem [thread:$0]  %s231_s0, 256, %s18_s16, [#allocation3]  }
  0x11   :  { %165 = dma.done.wait [#allocation3], 256  }
  0x12   :  { %166 = vsyncadd [#allocation3], 4294967040  ;;  %v31_v0 = vld [vmem:[#allocation2 + $0x8] sm:$0xff]  ;;  %v30_v1 = vld [vmem:[#allocation2] sm:$0xff]  ;;  %s170_s27 = smov 1   ;;  %s171_s28 = smov 127   ;;  %v58_v2 = vlaneseq }
  0x13   :  { %36 = vrot.lane.b32.xlu1 %v31_v0, %s170_s27  ;;  %47 = vrot.lane.b32.xlu0 %v30_v1, %s171_s28  ;;  %v32_v6 = vld [vmem:[%s232_s1] sm:$0x3]  ;;  %vm42_vm0 = vcmask 7168   ;;  %vm51_vm1 = vcmask 1039360   ;;  %s172_s1 = smov [#allocation5]  }
  0x14   :  { %v59_v3 = vshrl.u32 %v58_v2, 7  ;;  %v33_v7 = vld [vmem:[%s233_s2] sm:$0x3]  ;;  %s108_s2 = sshll.u32 %s172_s1, 4  ;;  %s109_s2 = int_to_ptr.vmem [resolvable:$true] %s108_s2 }
  0x15   :  { %v34_v12 = vld [vmem:[%s234_s3] sm:$0x3]  ;;  %s143_s3 = scalar_lea.vmem %s109_s2, 256  ;;  %p148_p9 = scmp.lt.s32.totalorder %s109_s2, %s109_s2 }
  0x16   :  { %v64_v4 = vsub.s32 1, %v59_v3  ;;  %v60_v5 = vsub.s32 0, %v59_v3  ;;  %p144_p8 = scmp.ne.s32.totalorder %s109_s2, %s143_s3  ;;  %p149_p10 = scmp.lt.s32.totalorder %s143_s3, %s143_s3 }
  0x17   :  { %40 = vrot.lane.b32.xlu1 %v30_v1, %s170_s27  ;;  %49 = vrot.lane.b32.xlu0 %v31_v0, %s171_s28 }
  0x18   :  { %v65_v8 = vrot.slane %v32_v6, %v64_v4  ;;  %v61_v9 = vrot.slane %v32_v6, %v60_v5  ;;  %v74_v13 = vrot.slane %v33_v7, %v60_v5  ;;  %v78_v14 = vrot.slane %v33_v7, %v64_v4  ;;  %p150_p11 = por %p149_p10, %p148_p9 }
  0x19   :  { %v89_v17 = vrot.slane %v34_v12, %v60_v5  ;;  %v93_v18 = vrot.slane %v34_v12, %v64_v4 }
  0x1a   :  { %v69_v15 = vmul.f32 %v65_v8, %v31_v0  ;;  %v68_v16 = vmul.f32 %v61_v9, %v30_v1  ;;  %p151_p12 = pnand %p150_p11, %p144_p8 }
  0x85   :  { %v37_v10 = vpop.permute.xlu1 %36  ;;  %v48_v11 = vpop.permute.xlu0 %47 }
  0x89   :  { %v41_v19 = vpop.permute.xlu1 %40  ;;  %v50_v20 = vpop.permute.xlu0 %49 }
  0x8a   :  { %v43_v21 = vsel %vm42_vm0, %v41_v19, %v37_v10  ;;  %v46_v22 = vsel %vm42_vm0, %v37_v10, %v41_v19  ;;  %v52_v23 = vsel %vm51_vm1, %v48_v11, %v50_v20  ;;  %v56_v24 = vsel %vm51_vm1, %v50_v20, %v48_v11 }
  0x8b   :  { %v81_v25 = vmul.f32 %v74_v13, %v52_v23  ;;  %v82_v26 = vmul.f32 %v78_v14, %v56_v24  ;;  %v96_v27 = vmul.f32 %v89_v17, %v46_v22  ;;  %v97_v28 = vmul.f32 %v93_v18, %v43_v21 }
  0x8d   :  { %v83_v29 = vadd.f32 %v81_v25, %v68_v16  ;;  %v84_v30 = vadd.f32 %v82_v26, %v69_v15 }
  0x8f   :  { %v98_v31 = vadd.f32 %v96_v27, %v83_v29  ;;  %v99_v32 = vadd.f32 %v97_v28, %v84_v30 }
  0x91   :  { %100 = vst [vmem:[#allocation5] sm:$0xff] %v98_v31  ;;  %101 = vst [vmem:[#allocation5 + $0x8] sm:$0xff] %v99_v32 }
  0x92   :  { %154 = shalt.err (!%p151_p12)
}
  0x93   :  { %s155_s10 = scalar_lea.hbm %s235_s4, 256 }
  0x94   :  { %p156_p13 = scmp.ne.s32.totalorder %s235_s4, %s155_s10  ;;  %p159_p0 = scmp.lt.u32.totalorder %s155_s10, %s235_s4 }
  0x96   :  { %p161_p1 = pnand %p159_p0, %p156_p13 }
  0x98   :  { %164 = shalt.err (!%p161_p1)
}
  0x99   :  { %111 = dma.vmem_to_hbm [thread:$0]  %s109_s2, 256, %s235_s4, [#allocation4]  }
  0x9a   :  { %167 = dma.done.wait [#allocation4], 256  }
  0x9b   :  { %168 = vsyncadd [#allocation4], 4294967040 }
  0x9c   :  { %115 = vsyncpa [#allocation3], 1 }
  0x9d   :  { %116 = vsyncpa [#allocation4], 1 }

</bundles_post_ra>
